<compile_context>
chip_gen: v6e
topology: v6e:2x2x1
jax: 0.10.0
libtpu: 0.0.40
codegen_flags: <defaults>
</compile_context>

<pallas_src>
import functools

import jax
import jax.numpy as jnp
from jax.experimental import pallas as pl
from jax.experimental.pallas import tpu as pltpu

LOG_STD_MIN = -20.0
LOG_STD_MAX = 2.0


def _round_up(x, m):
    return (x + m - 1) // m * m


def soft_actor_kernel(x_ref, w1_ref, b1_ref, w2_ref, b2_ref, w3_ref, b3_ref,
                      out_ref, *, num_actions):
    # Hidden layer 1: Linear + ReLU (f32 accumulation).
    h = jnp.dot(x_ref[...], w1_ref[...], preferred_element_type=jnp.float32)
    h = jnp.maximum(h + b1_ref[...], 0.0)

    # Hidden layer 2: Linear + ReLU.
    h = jnp.dot(h.astype(w2_ref.dtype), w2_ref[...],
                preferred_element_type=jnp.float32)
    h = jnp.maximum(h + b2_ref[...], 0.0)

    # Output layer: Linear (Identity activation).
    out = jnp.dot(h.astype(w3_ref.dtype), w3_ref[...],
                  preferred_element_type=jnp.float32)
    out = out + b3_ref[...]

    # Fused chunk + clamp: lanes [num_actions, 2*num_actions) hold log_std;
    # clamp only those lanes (free VPU work, avoids a separate XLA pass).
    lane = jax.lax.broadcasted_iota(jnp.int32, out.shape, 1)
    clamped = jnp.clip(out, LOG_STD_MIN, LOG_STD_MAX)
    out = jnp.where(lane >= num_actions, clamped, out)

    out_ref[...] = out.astype(out_ref.dtype)


@functools.partial(jax.jit, static_argnames=("block_b", "use_bf16"))
def soft_actor_forward(state, params, *, block_b=2048, use_bf16=False):
    """state: [B, num_states] f32. params: dict of [in, out] weights + (1, out) biases."""
    w1, b1, w2, b2, w3, b3 = (params["w1"], params["b1"], params["w2"],
                              params["b2"], params["w3"], params["b3"])
    B, S = state.shape
    H0 = w1.shape[1]
    H1 = w2.shape[1]
    O = w3.shape[1]
    num_actions = O // 2

    # --- Adaptive batch tiling ------------------------------------------
    # n_steps grid iterations; >=2 when the batch is big enough so the
    # "parallel" axis can use both TensorCores on v7x.  Tile rows are a
    # multiple of 8 (sublanes); total zero padding is at most 8*n_steps rows.
    n_steps = max(1, pl.cdiv(B, block_b))
    if B >= 16 and n_steps < 2:
        n_steps = 2
    tb = _round_up(pl.cdiv(B, n_steps), 8)
    Bp = n_steps * tb

    xp = state if Bp == B else jnp.zeros((Bp, S), state.dtype).at[:B].set(state)

    if use_bf16:
        # bf16 MXU operands (v6e/v7x native rate, half the operand bytes);
        # accumulation, biases, ReLU and clamp stay f32 in-kernel.
        xp = xp.astype(jnp.bfloat16)
        w1 = w1.astype(jnp.bfloat16)
        w2 = w2.astype(jnp.bfloat16)
        w3 = w3.astype(jnp.bfloat16)

    grid = (n_steps,)

    # Streamed state/output tiles; weights & biases VMEM-resident (constant
    # index_maps).  Every last block dim equals the full array dim -> no
    # feature padding needed.
    in_specs = [
        pl.BlockSpec((tb, S), lambda i: (i, 0)),    # state tile (streamed)
        pl.BlockSpec((S, H0), lambda i: (0, 0)),    # w1 (resident)
        pl.BlockSpec((1, H0), lambda i: (0, 0)),    # b1
        pl.BlockSpec((H0, H1), lambda i: (0, 0)),   # w2
        pl.BlockSpec((1, H1), lambda i: (0, 0)),    # b2
        pl.BlockSpec((H1, O), lambda i: (0, 0)),    # w3
        pl.BlockSpec((1, O), lambda i: (0, 0)),     # b3
    ]
    out_specs = pl.BlockSpec((tb, O), lambda i: (i, 0))

    flops = 2 * Bp * (S * H0 + H0 * H1 + H1 * O)
    x_item = 2 if use_bf16 else 4
    bytes_accessed = (Bp * S * x_item + Bp * O * 4
                      + (S * H0 + H0 * H1 + H1 * O) * x_item
                      + (H0 + H1 + O) * 4)
    cost = pl.CostEstimate(flops=flops, transcendentals=0,
                           bytes_accessed=bytes_accessed)

    # Scoped-VMEM limit: double-buffered in/out tiles + resident weights, with
    # headroom; floor at the v5e default (16 MiB), cap well under v7x's 64 MiB.
    vmem_bytes = (2 * tb * (S * x_item + O * 4)
                  + 2 * (S * H0 + H0 * H1 + H1 * O) * x_item
                  + 2 * (H0 + H1 + O) * 4)
    vmem_limit = min(max(2 * vmem_bytes, 16 * 1024 * 1024), 48 * 1024 * 1024)

    fused = pl.pallas_call(
        functools.partial(soft_actor_kernel, num_actions=num_actions),
        out_shape=jax.ShapeDtypeStruct((Bp, O), jnp.float32),
        grid=grid,
        in_specs=in_specs,
        out_specs=out_specs,
        compiler_params=pltpu.CompilerParams(
            dimension_semantics=("parallel",),
            vmem_limit_bytes=vmem_limit),
        cost_estimate=cost,
    )(xp, w1, b1, w2, b2, w3, b3)

    # Strip batch padding; clamp already fused into the kernel epilogue.
    out = fused[:B]
    mean = out[:, :num_actions]
    log_std = out[:, num_actions:]
    return mean, log_std


def init_params(key, num_states, hidden_dims, num_actions):
    """Deterministic synthetic parameters. Weights stored as [in, out]."""
    dims = [num_states] + list(hidden_dims) + [2 * num_actions]
    params = {}
    for i in range(len(dims) - 1):
        key, kw, kb = jax.random.split(key, 3)
        fan_in = dims[i]
        bound = 1.0 / jnp.sqrt(fan_in)
        # [in, out] layout (already transposed vs PyTorch's [out, in])
        params[f"w{i+1}"] = jax.random.uniform(
            kw, (dims[i], dims[i + 1]), jnp.float32, -bound, bound)
        params[f"b{i+1}"] = jax.random.uniform(
            kb, (1, dims[i + 1]), jnp.float32, -bound, bound)
    return params


def soft_actor_ref(state, params):
    """Pure-JAX reference for correctness checking."""
    h = jnp.maximum(state @ params["w1"] + params["b1"], 0.0)
    h = jnp.maximum(h @ params["w2"] + params["b2"], 0.0)
    out = h @ params["w3"] + params["b3"]
    a = out.shape[-1] // 2
    return out[:, :a], jnp.clip(out[:, a:], LOG_STD_MIN, LOG_STD_MAX)


if __name__ == "__main__":
    key = jax.random.PRNGKey(0)

    # Small shapes consistent with the module.
    batch = 2
    num_states = 16
    hidden_dims = [32, 32]
    num_actions = 4

    key, kp, kx = jax.random.split(key, 3)
    params = init_params(kp, num_states, hidden_dims, num_actions)
    state = jax.random.normal(kx, (batch, num_states), jnp.float32)

    mean, log_std = soft_actor_forward(state, params)
    jax.block_until_ready((mean, log_std))

    mean_r, log_std_r = soft_actor_ref(state, params)
    assert mean.shape == (batch, num_actions)
    assert log_std.shape == (batch, num_actions)
    assert jnp.allclose(mean, mean_r, atol=1e-5, rtol=1e-5)
    assert jnp.allclose(log_std, log_std_r, atol=1e-5, rtol=1e-5)

    # Exercise multi-step grid + non-multiple-of-tile tail (adaptive tiling).
    key, kx2 = jax.random.split(key)
    state2 = jax.random.normal(kx2, (200, num_states), jnp.float32)
    mean2, log_std2 = soft_actor_forward(state2, params, block_b=64)
    jax.block_until_ready((mean2, log_std2))
    mean2_r, log_std2_r = soft_actor_ref(state2, params)
    assert jnp.allclose(mean2, mean2_r, atol=1e-5, rtol=1e-5)
    assert jnp.allclose(log_std2, log_std2_r, atol=1e-5, rtol=1e-5)

    # Optional bf16-operand path (v6e/v7x MXU-native); f32 accumulation, so
    # only small deviation from the f32 reference is expected.
    mean3, log_std3 = soft_actor_forward(state2, params, use_bf16=True)
    jax.block_until_ready((mean3, log_std3))
    assert jnp.all(jnp.isfinite(mean3)) and jnp.all(jnp.isfinite(log_std3))
    assert jnp.allclose(mean3, mean2_r, atol=5e-2, rtol=5e-2)
    assert jnp.allclose(log_std3, log_std2_r, atol=5e-2, rtol=5e-2)

    print("KERNEL_OK")
</pallas_src>

<mosaic_0001>
module attributes {stable_mosaic.version = 11 : i64} {
  func.func @soft_actor_kernel(%arg0: i32, %arg1: memref<8x16xf32, #tpu.memory_space<vmem>>, %arg2: memref<16x32xf32, #tpu.memory_space<vmem>>, %arg3: memref<1x32xf32, #tpu.memory_space<vmem>>, %arg4: memref<32x32xf32, #tpu.memory_space<vmem>>, %arg5: memref<1x32xf32, #tpu.memory_space<vmem>>, %arg6: memref<32x8xf32, #tpu.memory_space<vmem>>, %arg7: memref<1x8xf32, #tpu.memory_space<vmem>>, %arg8: memref<8x8xf32, #tpu.memory_space<vmem>>) attributes {dimension_semantics = [#tpu.dimension_semantics<parallel>], iteration_bounds = array<i64: 1>, scalar_prefetch = 0 : i64, scratch_operands = 0 : i64, tpu.core_type = #tpu.core_type<tc>, window_params = [{transform_indices = @transform_0, window_bounds = array<i64: 8, 16>}, {pipeline_mode = #tpu.pipeline_mode<synchronous>, transform_indices = @transform_1, window_bounds = array<i64: 16, 32>}, {pipeline_mode = #tpu.pipeline_mode<synchronous>, transform_indices = @transform_2, window_bounds = array<i64: 1, 32>}, {pipeline_mode = #tpu.pipeline_mode<synchronous>, transform_indices = @transform_3, window_bounds = array<i64: 32, 32>}, {pipeline_mode = #tpu.pipeline_mode<synchronous>, transform_indices = @transform_4, window_bounds = array<i64: 1, 32>}, {pipeline_mode = #tpu.pipeline_mode<synchronous>, transform_indices = @transform_5, window_bounds = array<i64: 32, 8>}, {pipeline_mode = #tpu.pipeline_mode<synchronous>, transform_indices = @transform_6, window_bounds = array<i64: 1, 8>}, {transform_indices = @transform_7, window_bounds = array<i64: 8, 8>}]} {
    %c0 = arith.constant 0 : index
    %c0_0 = arith.constant 0 : index
    %0 = vector.load %arg1[%c0, %c0_0] : memref<8x16xf32, #tpu.memory_space<vmem>>, vector<8x16xf32>
    %c0_1 = arith.constant 0 : index
    %c0_2 = arith.constant 0 : index
    %1 = vector.load %arg2[%c0_1, %c0_2] : memref<16x32xf32, #tpu.memory_space<vmem>>, vector<16x32xf32>
    %cst = arith.constant dense<0.000000e+00> : vector<8x32xf32>
    %2 = tpu.matmul %0, %1, %cst {dimension_numbers = #tpu.dot_dimension_numbers<[1], [0], [0], [1], [0, 0, 1, 1], [], []>} : vector<8x16xf32>, vector<16x32xf32>, vector<8x32xf32> -> vector<8x32xf32>
    %c0_3 = arith.constant 0 : index
    %c0_4 = arith.constant 0 : index
    %3 = vector.load %arg3[%c0_3, %c0_4] : memref<1x32xf32, #tpu.memory_space<vmem>>, vector<1x32xf32>
    %4 = vector.broadcast %3 : vector<1x32xf32> to vector<8x32xf32>
    %5 = arith.addf %2, %4 : vector<8x32xf32>
    %cst_5 = arith.constant 0.000000e+00 : f32
    %6 = vector.broadcast %cst_5 : f32 to vector<8x32xf32>
    %7 = arith.maximumf %5, %6 : vector<8x32xf32>
    %c0_6 = arith.constant 0 : index
    %c0_7 = arith.constant 0 : index
    %8 = vector.load %arg4[%c0_6, %c0_7] : memref<32x32xf32, #tpu.memory_space<vmem>>, vector<32x32xf32>
    %cst_8 = arith.constant dense<0.000000e+00> : vector<8x32xf32>
    %9 = tpu.matmul %7, %8, %cst_8 {dimension_numbers = #tpu.dot_dimension_numbers<[1], [0], [0], [1], [0, 0, 1, 1], [], []>} : vector<8x32xf32>, vector<32x32xf32>, vector<8x32xf32> -> vector<8x32xf32>
    %c0_9 = arith.constant 0 : index
    %c0_10 = arith.constant 0 : index
    %10 = vector.load %arg5[%c0_9, %c0_10] : memref<1x32xf32, #tpu.memory_space<vmem>>, vector<1x32xf32>
    %11 = vector.broadcast %10 : vector<1x32xf32> to vector<8x32xf32>
    %12 = arith.addf %9, %11 : vector<8x32xf32>
    %cst_11 = arith.constant 0.000000e+00 : f32
    %13 = vector.broadcast %cst_11 : f32 to vector<8x32xf32>
    %14 = arith.maximumf %12, %13 : vector<8x32xf32>
    %c0_12 = arith.constant 0 : index
    %c0_13 = arith.constant 0 : index
    %15 = vector.load %arg6[%c0_12, %c0_13] : memref<32x8xf32, #tpu.memory_space<vmem>>, vector<32x8xf32>
    %cst_14 = arith.constant dense<0.000000e+00> : vector<8x8xf32>
    %16 = tpu.matmul %14, %15, %cst_14 {dimension_numbers = #tpu.dot_dimension_numbers<[1], [0], [0], [1], [0, 0, 1, 1], [], []>} : vector<8x32xf32>, vector<32x8xf32>, vector<8x8xf32> -> vector<8x8xf32>
    %c0_15 = arith.constant 0 : index
    %c0_16 = arith.constant 0 : index
    %17 = vector.load %arg7[%c0_15, %c0_16] : memref<1x8xf32, #tpu.memory_space<vmem>>, vector<1x8xf32>
    %18 = vector.broadcast %17 : vector<1x8xf32> to vector<8x8xf32>
    %19 = arith.addf %16, %18 : vector<8x8xf32>
    %20 = tpu.iota {dimensions = array<i32: 1>} : vector<8x8xi32>
    %cst_17 = arith.constant -2.000000e+01 : f32
    %cst_18 = arith.constant 2.000000e+00 : f32
    %21 = vector.broadcast %cst_17 : f32 to vector<8x8xf32>
    %22 = arith.maximumf %21, %19 : vector<8x8xf32>
    %23 = vector.broadcast %cst_18 : f32 to vector<8x8xf32>
    %24 = arith.minimumf %23, %22 : vector<8x8xf32>
    %c4_i32 = arith.constant 4 : i32
    %25 = vector.broadcast %c4_i32 : i32 to vector<8x8xi32>
    %26 = arith.cmpi sge, %20, %25 : vector<8x8xi32>
    %27 = arith.select %26, %24, %19 : vector<8x8xi1>, vector<8x8xf32>
    %c0_19 = arith.constant 0 : index
    %c0_20 = arith.constant 0 : index
    %28 = vector.load %arg8[%c0_19, %c0_20] : memref<8x8xf32, #tpu.memory_space<vmem>>, vector<8x8xf32>
    tpu.vector_store %arg8[%c0_19, %c0_20], %27 {strides = array<i32>} : memref<8x8xf32, #tpu.memory_space<vmem>>, vector<8x8xf32>,
    return
  }
  func.func @transform_0(%arg0: i32) -> (i32, i32) {
    %c0_i32 = arith.constant 0 : i32
    %c0_i32_0 = arith.constant 0 : i32
    return %arg0, %c0_i32 : i32, i32
  }
  func.func @transform_1(%arg0: i32) -> (i32, i32) {
    %c0_i32 = arith.constant 0 : i32
    %c0_i32_0 = arith.constant 0 : i32
    %c0_i32_1 = arith.constant 0 : i32
    return %c0_i32, %c0_i32_0 : i32, i32
  }
  func.func @transform_2(%arg0: i32) -> (i32, i32) {
    %c0_i32 = arith.constant 0 : i32
    %c0_i32_0 = arith.constant 0 : i32
    %c0_i32_1 = arith.constant 0 : i32
    return %c0_i32, %c0_i32_0 : i32, i32
  }
  func.func @transform_3(%arg0: i32) -> (i32, i32) {
    %c0_i32 = arith.constant 0 : i32
    %c0_i32_0 = arith.constant 0 : i32
    %c0_i32_1 = arith.constant 0 : i32
    return %c0_i32, %c0_i32_0 : i32, i32
  }
  func.func @transform_4(%arg0: i32) -> (i32, i32) {
    %c0_i32 = arith.constant 0 : i32
    %c0_i32_0 = arith.constant 0 : i32
    %c0_i32_1 = arith.constant 0 : i32
    return %c0_i32, %c0_i32_0 : i32, i32
  }
  func.func @transform_5(%arg0: i32) -> (i32, i32) {
    %c0_i32 = arith.constant 0 : i32
    %c0_i32_0 = arith.constant 0 : i32
    %c0_i32_1 = arith.constant 0 : i32
    return %c0_i32, %c0_i32_0 : i32, i32
  }
  func.func @transform_6(%arg0: i32) -> (i32, i32) {
    %c0_i32 = arith.constant 0 : i32
    %c0_i32_0 = arith.constant 0 : i32
    %c0_i32_1 = arith.constant 0 : i32
    return %c0_i32, %c0_i32_0 : i32, i32
  }
  func.func @transform_7(%arg0: i32) -> (i32, i32) {
    %c0_i32 = arith.constant 0 : i32
    %c0_i32_0 = arith.constant 0 : i32
    return %arg0, %c0_i32 : i32, i32
  }
}

</mosaic_0001>

<bundles_post_ra>
// kernel: soft_actor_forward.1
= control target key start
LH: loop header
LB: loop body
LE: loop exit
PB: predicated region body
PF: predicated region fallthrough
CT: control target
= control target key end

     0   :  { %v343_v0 = vmov 0.0   ;;  %vm344_vm0 = vmmov 0   ;;  %vm36_vm1 = vcmask 130048   ;;  %vm122_vm2 = vcmask 261120   ;;  %s432_s1 = inlined_call_operand.vmem [shape: f32[16,32], index: 1, kind: input, shape index: {}]   ;;  %s433_s0 = inlined_call_operand.vmem [shape: f32[8,16], index: 0, kind: input, shape index: {}]   ;;  %s434_s3 = inlined_call_operand.vmem [shape: f32[32,32], index: 3, kind: input, shape index: {}]   ;;  %s435_s5 = inlined_call_operand.vmem [shape: f32[32,8], index: 5, kind: input, shape index: {}]   ;;  %s436_s2 = inlined_call_operand.vmem [shape: f32[1,32], index: 2, kind: input, shape index: {}]   ;;  %s437_s4 = inlined_call_operand.vmem [shape: f32[1,32], index: 4, kind: input, shape index: {}]   ;;  %s438_s6 = inlined_call_operand.vmem [shape: f32[1,8], index: 6, kind: input, shape index: {}]   ;;  %s439_s7 = inlined_call_operand.vmem [shape: f32[8,8], index: 7, kind: output, shape index: {}]  }
   0x1   :  { %312 = vmatprep.subr.mxu0 %v343_v0  ;;  %v28_v1 = vld [vmem:[%s432_s1 + $0x8] sm:$0xff]  ;;  %v27_v2 = vld [vmem:[%s432_s1] sm:$0xff]  ;;  %316 = vmatprep.mubr.msk.f32.mxu0 %vm344_vm0, %v343_v0  ;;  %v114_v4 = vld [vmem:[%s434_s3 + $0x18] sm:$0xff]  ;;  %v281_v22 = vlaneseq  ;;  %vm287_vm4 = vcmask 64512  }
   0x2   :  { %313 = vmatpush3.msra.mxu0 %v28_v1  ;;  %v26_v3 = vld [vmem:[%s433_s0] sm:$0xff]  ;;  %319 = vmatprep.subr.mxu1 %v343_v0  ;;  %v113_v5 = vld [vmem:[%s434_s3 + $0x10] sm:$0xff]  ;;  %v112_v6 = vld [vmem:[%s434_s3 + $0x8] sm:$0xff] }
   0x3   :  { %314 = vmatprep.subr.mxu0 %v343_v0  ;;  %320 = vmatpush3.msra.mxu1 %v114_v4  ;;  %v111_v7 = vld [vmem:[%s434_s3] sm:$0xff]  ;;  %v200_v8 = vld [vmem:[%s435_s5 + $0x18] sm:$0xff]  ;;  %v199_v14 = vld [vmem:[%s435_s5 + $0x10] sm:$0xff]  ;;  %v282_v25 = vand.u32 127, %v281_v22 }
   0x4   :  { %315 = vmatpush3.msra.mxu0 %v27_v2  ;;  %321 = vmatprep.subr.mxu1 %v343_v0  ;;  %v293_v9 = vld [vmem:[%s436_s2] ss:$0 sm:$0xff]  ;;  %v198_v15 = vld [vmem:[%s435_s5 + $0x8] sm:$0xff] }
   0x5   :  { %317 = vmatmul.mubr.msk.f32.vlgmr.msra.gmra.mxu0 %vm36_vm1, %v26_v3  ;;  %327 = vmatprep.mubr.msk.f32.mxu1 %vm344_vm0, %v343_v0  ;;  %v197_v16 = vld [vmem:[%s435_s5] sm:$0xff]  ;;  %vm285_vm3 = vcmp.ge.s32.totalorder %v282_v25, 4 }
   0x6   :  { %330 = vmatprep.subr.mxu0 %v343_v0  ;;  %338 = vmatprep.mubr.msk.f32.mxu0 %vm344_vm0, %v343_v0  ;;  %v295_v17 = vld [vmem:[%s437_s4] ss:$0 sm:$0xff] }
   0x7   :  { %322 = vmatpush3.msra.mxu1 %v113_v5  ;;  %331 = vmatpush3.msra.mxu0 %v200_v8  ;;  %v297_v23 = vld [vmem:[%s438_s6] ss:$0 sm:$0xff] }
   0x8   :  { %323 = vmatprep.subr.mxu1 %v343_v0  ;;  %332 = vmatprep.subr.mxu0 %v343_v0 }
   0x9   :  { %324 = vmatpush3.msra.mxu1 %v112_v6  ;;  %333 = vmatpush3.msra.mxu0 %v199_v14 }
   0xa   :  { %325 = vmatprep.subr.mxu1 %v343_v0  ;;  %334 = vmatprep.subr.mxu0 %v343_v0 }
   0xb   :  { %326 = vmatpush3.msra.mxu1 %v111_v7  ;;  %335 = vmatpush3.msra.mxu0 %v198_v15 }
   0xc   :  { %336 = vmatprep.subr.mxu0 %v343_v0 }
   0xd   :  { %337 = vmatpush3.msra.mxu0 %v197_v16 }
  0xc5   :  { %v106_v10 = vpop.f32.mrf.mxu0 }
  0xc6   :  { %v107_v11 = vadd.f32 %v293_v9, %v106_v10 }
  0xc7   :  { %v318_v12 = vpop.f32.mrf.mxu0 }
  0xc8   :  { %v110_v13 = vmax.f32 %v107_v11, 0.0 }
  0xca   :  { %328 = vmatmul.mubr.msk.f32.vlgmr.msra.gmra.mxu1 %vm122_vm2, %v110_v13 }
 0x18a   :  { %v192_v18 = vpop.f32.mrf.mxu1 }
 0x18b   :  { %v193_v19 = vadd.f32 %v295_v17, %v192_v18 }
 0x18c   :  { %v329_v20 = vpop.f32.mrf.mxu1 }
 0x18d   :  { %v196_v21 = vmax.f32 %v193_v19, 0.0 }
 0x18f   :  { %339 = vmatmul.mubr.msk.f32.vlgmr.msra.gmra.mxu0 %vm122_vm2, %v196_v21 }
 0x24f   :  { %v277_v24 = vpop.f32.mrf.mxu0 }
 0x250   :  { %v278_v26 = vadd.f32 %v297_v23, %v277_v24 }
 0x251   :  { %v340_v27 = vpop.f32.mrf.mxu0 }
 0x252   :  { %v283_v28 = vmax.f32 %v278_v26, -20.0 }
 0x254   :  { %v284_v29 = vmin.f32 %v283_v28, 2.0 }
 0x256   :  { %v286_v30 = vsel %vm285_vm3, %v284_v29, %v278_v26 }
 0x257   :  { %288 = vst.msk [vmem:[%s439_s7] sm:$0xff] %vm287_vm4, %v286_v30 }

</bundles_post_ra>
